<compile_context>
chip_gen: v7x
topology: tpu7x:2x2x1
jax: 0.10.0
libtpu: 0.0.40
codegen_flags: <defaults>
</compile_context>

<pallas_src>
import jax
import jax.numpy as jnp
from jax.experimental import pallas as pl
from jax.experimental.pallas import tpu as pltpu

STATE_DIM = 3
ACTION_DIM = 2
HIDDEN = 128


def _round_up(x, m):
    return ((x + m - 1) // m) * m


def critic_kernel(s_ref, a_ref, w1s_ref, w1a_ref, b1_ref,
                  w2_ref, b2_ref, w3_ref, b3_ref, o_ref):
    """One batch tile of the Critic MLP."""
    # fc1 with the concat fused: (TB,3)@(3,128) + (TB,2)@(2,128), f32 acc.
    h1 = (jnp.dot(s_ref[...], w1s_ref[...], preferred_element_type=jnp.float32)
          + jnp.dot(a_ref[...], w1a_ref[...], preferred_element_type=jnp.float32)
          + b1_ref[...])
    h1 = jnp.maximum(h1, 0.0)                                   # (TB, 128) f32

    # fc2: (TB,128)@(128,128), bf16 operands, f32 accumulation.
    h2 = jnp.dot(h1.astype(w2_ref.dtype), w2_ref[...],
                 preferred_element_type=jnp.float32) + b2_ref[...]
    h2 = jnp.maximum(h2, 0.0)                                   # (TB, 128) f32

    # fc3 (N=1): VPU multiply + XLU lane reduce instead of a (128,1) MXU matmul.
    q = jnp.sum(h2 * w3_ref[...], axis=-1, keepdims=True) + b3_ref[...]
    o_ref[...] = q.astype(o_ref.dtype)                          # (TB, 1)


def prepare_params(params, compute_dtype=jnp.bfloat16):
    """Split/cast f32 (in,out)-layout params into the kernel layout."""
    w1, b1, w2, b2, w3, b3 = params
    return (
        w1[:STATE_DIM].astype(compute_dtype),       # (3, 128)   fc1 state half
        w1[STATE_DIM:].astype(compute_dtype),       # (2, 128)   fc1 action half
        b1.astype(jnp.float32),                     # (1, 128)
        w2.astype(compute_dtype),                   # (128, 128)
        b2.astype(jnp.float32),                     # (1, 128)
        w3.reshape(1, HIDDEN).astype(jnp.float32),  # (1, 128)   fc3 as a row
        b3.reshape(1, 1).astype(jnp.float32),       # (1, 1)
    )


def critic_forward(state, action, params, *, block_b=512,
                   compute_dtype=jnp.bfloat16):
    """state: (B, STATE_DIM), action: (B, ACTION_DIM) -> (B, 1) float32."""
    B = state.shape[0]
    w1s, w1a, b1, w2, b2, w3r, b3 = prepare_params(params, compute_dtype)

    # Batch tile: at most `block_b`, always a multiple of 8 sublanes.
    tb = min(block_b, _round_up(max(B, 1), 8))
    b_pad = _round_up(B, tb)

    s = state.astype(compute_dtype)
    a = action.astype(compute_dtype)
    if b_pad != B:
        s = jnp.pad(s, ((0, b_pad - B), (0, 0)))
        a = jnp.pad(a, ((0, b_pad - B), (0, 0)))

    itemsize = jnp.dtype(compute_dtype).itemsize
    weight_bytes = ((STATE_DIM + ACTION_DIM) * HIDDEN + HIDDEN * HIDDEN) * itemsize \
                   + (2 * HIDDEN + HIDDEN + 1) * 4
    cost = pl.CostEstimate(
        flops=2 * b_pad * ((STATE_DIM + ACTION_DIM) * HIDDEN
                           + HIDDEN * HIDDEN + HIDDEN),
        transcendentals=0,
        bytes_accessed=int(b_pad * (STATE_DIM + ACTION_DIM) * itemsize
                           + b_pad * 4 + weight_bytes),
    )

    out = pl.pallas_call(
        critic_kernel,
        out_shape=jax.ShapeDtypeStruct((b_pad, 1), jnp.float32),
        grid=(b_pad // tb,),
        in_specs=[
            pl.BlockSpec((tb, STATE_DIM), lambda i: (i, 0)),       # state tile
            pl.BlockSpec((tb, ACTION_DIM), lambda i: (i, 0)),      # action tile
            pl.BlockSpec((STATE_DIM, HIDDEN), lambda i: (0, 0)),   # w1 (state)
            pl.BlockSpec((ACTION_DIM, HIDDEN), lambda i: (0, 0)),  # w1 (action)
            pl.BlockSpec((1, HIDDEN), lambda i: (0, 0)),           # b1
            pl.BlockSpec((HIDDEN, HIDDEN), lambda i: (0, 0)),      # w2
            pl.BlockSpec((1, HIDDEN), lambda i: (0, 0)),           # b2
            pl.BlockSpec((1, HIDDEN), lambda i: (0, 0)),           # w3 row
            pl.BlockSpec((1, 1), lambda i: (0, 0)),                # b3
        ],
        out_specs=pl.BlockSpec((tb, 1), lambda i: (i, 0)),
        compiler_params=pltpu.CompilerParams(
            dimension_semantics=("parallel",),     # shard batch over TCs (v7x)
            vmem_limit_bytes=32 * 1024 * 1024,     # plenty of headroom on v7x
        ),
        cost_estimate=cost,
    )(s, a, w1s, w1a, b1, w2, b2, w3r, b3)

    return out[:B]


def init_params(key):
    """Deterministic init mimicking nn.Linear default (U[-1/sqrt(fan_in), +])."""
    def linear(key, fan_in, fan_out):
        kw, kb = jax.random.split(key)
        bound = 1.0 / jnp.sqrt(fan_in)
        w = jax.random.uniform(kw, (fan_in, fan_out), jnp.float32, -bound, bound)
        b = jax.random.uniform(kb, (1, fan_out), jnp.float32, -bound, bound)
        return w, b

    k1, k2, k3 = jax.random.split(key, 3)
    w1, b1 = linear(k1, STATE_DIM + ACTION_DIM, HIDDEN)
    w2, b2 = linear(k2, HIDDEN, HIDDEN)
    w3, b3 = linear(k3, HIDDEN, 1)
    return (w1, b1, w2, b2, w3, b3)


def critic_reference_f32(state, action, params):
    """Pure-f32 reference matching the PyTorch module."""
    w1, b1, w2, b2, w3, b3 = params
    x = jnp.concatenate([state, action], axis=1).astype(jnp.float32)
    h1 = jnp.maximum(x @ w1 + b1, 0.0)
    h2 = jnp.maximum(h1 @ w2 + b2, 0.0)
    return h2 @ w3 + b3


def critic_reference_mixed(state, action, params, compute_dtype=jnp.bfloat16):
    """Reference mirroring the kernel's precision (bf16 operands, f32 acc)."""
    w1, b1, w2, b2, w3, b3 = params
    x = jnp.concatenate([state, action], axis=1).astype(compute_dtype)
    h1 = jnp.maximum(
        jnp.dot(x, w1.astype(compute_dtype),
                preferred_element_type=jnp.float32) + b1, 0.0)
    h2 = jnp.maximum(
        jnp.dot(h1.astype(compute_dtype), w2.astype(compute_dtype),
                preferred_element_type=jnp.float32) + b2, 0.0)
    return h2 @ w3 + b3


if __name__ == "__main__":
    key = jax.random.PRNGKey(0)
    kp = jax.random.fold_in(key, 0)
    params = init_params(kp)

    # Small single-tile case and a multi-tile case (exercises padding + grid).
    for B in (8, 600):
        kb = jax.random.fold_in(key, B)
        ks, ka = jax.random.split(kb)
        state = jax.random.normal(ks, (B, STATE_DIM), jnp.float32)
        action = jax.random.normal(ka, (B, ACTION_DIM), jnp.float32)

        q = jax.block_until_ready(critic_forward(state, action, params))
        assert q.shape == (B, 1)

        q_mixed = critic_reference_mixed(state, action, params)
        q_f32 = critic_reference_f32(state, action, params)
        assert jnp.allclose(q, q_mixed, atol=5e-3, rtol=5e-3), "mismatch vs mixed-precision reference"
        assert jnp.allclose(q, q_f32, atol=1e-1, rtol=1e-1), "mismatch vs f32 reference"

    print("KERNEL_OK")
</pallas_src>

<mosaic_0001>
module attributes {stable_mosaic.version = 11 : i64} {
  func.func @critic_kernel(%arg0: i32, %arg1: memref<8x3xbf16, #tpu.memory_space<vmem>>, %arg2: memref<8x2xbf16, #tpu.memory_space<vmem>>, %arg3: memref<3x128xbf16, #tpu.memory_space<vmem>>, %arg4: memref<2x128xbf16, #tpu.memory_space<vmem>>, %arg5: memref<1x128xf32, #tpu.memory_space<vmem>>, %arg6: memref<128x128xbf16, #tpu.memory_space<vmem>>, %arg7: memref<1x128xf32, #tpu.memory_space<vmem>>, %arg8: memref<1x128xf32, #tpu.memory_space<vmem>>, %arg9: memref<1x1xf32, #tpu.memory_space<vmem>>, %arg10: memref<8x1xf32, #tpu.memory_space<vmem>>) attributes {dimension_semantics = [#tpu.dimension_semantics<parallel>], iteration_bounds = array<i64: 1>, scalar_prefetch = 0 : i64, scratch_operands = 0 : i64, tpu.core_type = #tpu.core_type<tc>, window_params = [{transform_indices = @transform_0, window_bounds = array<i64: 8, 3>}, {transform_indices = @transform_1, window_bounds = array<i64: 8, 2>}, {pipeline_mode = #tpu.pipeline_mode<synchronous>, transform_indices = @transform_2, window_bounds = array<i64: 3, 128>}, {pipeline_mode = #tpu.pipeline_mode<synchronous>, transform_indices = @transform_3, window_bounds = array<i64: 2, 128>}, {pipeline_mode = #tpu.pipeline_mode<synchronous>, transform_indices = @transform_4, window_bounds = array<i64: 1, 128>}, {pipeline_mode = #tpu.pipeline_mode<synchronous>, transform_indices = @transform_5, window_bounds = array<i64: 128, 128>}, {pipeline_mode = #tpu.pipeline_mode<synchronous>, transform_indices = @transform_6, window_bounds = array<i64: 1, 128>}, {pipeline_mode = #tpu.pipeline_mode<synchronous>, transform_indices = @transform_7, window_bounds = array<i64: 1, 128>}, {pipeline_mode = #tpu.pipeline_mode<synchronous>, transform_indices = @transform_8, window_bounds = array<i64: 1, 1>}, {transform_indices = @transform_9, window_bounds = array<i64: 8, 1>}]} {
    %c0 = arith.constant 0 : index
    %c0_0 = arith.constant 0 : index
    %0 = vector.load %arg1[%c0, %c0_0] : memref<8x3xbf16, #tpu.memory_space<vmem>>, vector<8x3xbf16>
    %c0_1 = arith.constant 0 : index
    %c0_2 = arith.constant 0 : index
    %1 = vector.load %arg3[%c0_1, %c0_2] : memref<3x128xbf16, #tpu.memory_space<vmem>>, vector<3x128xbf16>
    %cst = arith.constant dense<0.000000e+00> : vector<8x128xf32>
    %2 = tpu.matmul %0, %1, %cst {dimension_numbers = #tpu.dot_dimension_numbers<[1], [0], [0], [1], [0, 0, 1, 1], [], []>} : vector<8x3xbf16>, vector<3x128xbf16>, vector<8x128xf32> -> vector<8x128xf32>
    %c0_3 = arith.constant 0 : index
    %c0_4 = arith.constant 0 : index
    %3 = vector.load %arg2[%c0_3, %c0_4] : memref<8x2xbf16, #tpu.memory_space<vmem>>, vector<8x2xbf16>
    %c0_5 = arith.constant 0 : index
    %c0_6 = arith.constant 0 : index
    %4 = vector.load %arg4[%c0_5, %c0_6] : memref<2x128xbf16, #tpu.memory_space<vmem>>, vector<2x128xbf16>
    %cst_7 = arith.constant dense<0.000000e+00> : vector<8x128xf32>
    %5 = tpu.matmul %3, %4, %cst_7 {dimension_numbers = #tpu.dot_dimension_numbers<[1], [0], [0], [1], [0, 0, 1, 1], [], []>} : vector<8x2xbf16>, vector<2x128xbf16>, vector<8x128xf32> -> vector<8x128xf32>
    %6 = arith.addf %2, %5 : vector<8x128xf32>
    %c0_8 = arith.constant 0 : index
    %c0_9 = arith.constant 0 : index
    %7 = vector.load %arg5[%c0_8, %c0_9] : memref<1x128xf32, #tpu.memory_space<vmem>>, vector<1x128xf32>
    %8 = vector.broadcast %7 : vector<1x128xf32> to vector<8x128xf32>
    %9 = arith.addf %6, %8 : vector<8x128xf32>
    %cst_10 = arith.constant 0.000000e+00 : f32
    %10 = vector.broadcast %cst_10 : f32 to vector<8x128xf32>
    %11 = arith.maximumf %9, %10 : vector<8x128xf32>
    %12 = arith.truncf %11 : vector<8x128xf32> to vector<8x128xbf16>
    %c0_11 = arith.constant 0 : index
    %c0_12 = arith.constant 0 : index
    %13 = vector.load %arg6[%c0_11, %c0_12] : memref<128x128xbf16, #tpu.memory_space<vmem>>, vector<128x128xbf16>
    %cst_13 = arith.constant dense<0.000000e+00> : vector<8x128xf32>
    %14 = tpu.matmul %12, %13, %cst_13 {dimension_numbers = #tpu.dot_dimension_numbers<[1], [0], [0], [1], [0, 0, 1, 1], [], []>} : vector<8x128xbf16>, vector<128x128xbf16>, vector<8x128xf32> -> vector<8x128xf32>
    %c0_14 = arith.constant 0 : index
    %c0_15 = arith.constant 0 : index
    %15 = vector.load %arg7[%c0_14, %c0_15] : memref<1x128xf32, #tpu.memory_space<vmem>>, vector<1x128xf32>
    %16 = vector.broadcast %15 : vector<1x128xf32> to vector<8x128xf32>
    %17 = arith.addf %14, %16 : vector<8x128xf32>
    %cst_16 = arith.constant 0.000000e+00 : f32
    %18 = vector.broadcast %cst_16 : f32 to vector<8x128xf32>
    %19 = arith.maximumf %17, %18 : vector<8x128xf32>
    %c0_17 = arith.constant 0 : index
    %c0_18 = arith.constant 0 : index
    %20 = vector.load %arg8[%c0_17, %c0_18] : memref<1x128xf32, #tpu.memory_space<vmem>>, vector<1x128xf32>
    %21 = vector.broadcast %20 : vector<1x128xf32> to vector<8x128xf32>
    %22 = arith.mulf %19, %21 : vector<8x128xf32>
    %cst_19 = arith.constant dense<0.000000e+00> : vector<8xf32>
    %23 = vector.multi_reduction <add>, %22, %cst_19 [1] : vector<8x128xf32> to vector<8xf32>
    %24 = vector.shape_cast %23 : vector<8xf32> to vector<8x1xf32>
    %c0_20 = arith.constant 0 : index
    %c0_21 = arith.constant 0 : index
    %25 = vector.load %arg9[%c0_20, %c0_21] : memref<1x1xf32, #tpu.memory_space<vmem>>, vector<1x1xf32>
    %26 = vector.broadcast %25 : vector<1x1xf32> to vector<8x1xf32>
    %27 = arith.addf %24, %26 : vector<8x1xf32>
    %c0_22 = arith.constant 0 : index
    %c0_23 = arith.constant 0 : index
    %28 = vector.load %arg10[%c0_22, %c0_23] : memref<8x1xf32, #tpu.memory_space<vmem>>, vector<8x1xf32>
    tpu.vector_store %arg10[%c0_22, %c0_23], %27 {strides = array<i32>} : memref<8x1xf32, #tpu.memory_space<vmem>>, vector<8x1xf32>,
    return
  }
  func.func @transform_0(%arg0: i32) -> (i32, i32) {
    %c0_i32 = arith.constant 0 : i32
    %c0_i32_0 = arith.constant 0 : i32
    return %arg0, %c0_i32 : i32, i32
  }
  func.func @transform_1(%arg0: i32) -> (i32, i32) {
    %c0_i32 = arith.constant 0 : i32
    %c0_i32_0 = arith.constant 0 : i32
    return %arg0, %c0_i32 : i32, i32
  }
  func.func @transform_2(%arg0: i32) -> (i32, i32) {
    %c0_i32 = arith.constant 0 : i32
    %c0_i32_0 = arith.constant 0 : i32
    %c0_i32_1 = arith.constant 0 : i32
    return %c0_i32, %c0_i32_0 : i32, i32
  }
  func.func @transform_3(%arg0: i32) -> (i32, i32) {
    %c0_i32 = arith.constant 0 : i32
    %c0_i32_0 = arith.constant 0 : i32
    %c0_i32_1 = arith.constant 0 : i32
    return %c0_i32, %c0_i32_0 : i32, i32
  }
  func.func @transform_4(%arg0: i32) -> (i32, i32) {
    %c0_i32 = arith.constant 0 : i32
    %c0_i32_0 = arith.constant 0 : i32
    %c0_i32_1 = arith.constant 0 : i32
    return %c0_i32, %c0_i32_0 : i32, i32
  }
  func.func @transform_5(%arg0: i32) -> (i32, i32) {
    %c0_i32 = arith.constant 0 : i32
    %c0_i32_0 = arith.constant 0 : i32
    %c0_i32_1 = arith.constant 0 : i32
    return %c0_i32, %c0_i32_0 : i32, i32
  }
  func.func @transform_6(%arg0: i32) -> (i32, i32) {
    %c0_i32 = arith.constant 0 : i32
    %c0_i32_0 = arith.constant 0 : i32
    %c0_i32_1 = arith.constant 0 : i32
    return %c0_i32, %c0_i32_0 : i32, i32
  }
  func.func @transform_7(%arg0: i32) -> (i32, i32) {
    %c0_i32 = arith.constant 0 : i32
    %c0_i32_0 = arith.constant 0 : i32
    %c0_i32_1 = arith.constant 0 : i32
    return %c0_i32, %c0_i32_0 : i32, i32
  }
  func.func @transform_8(%arg0: i32) -> (i32, i32) {
    %c0_i32 = arith.constant 0 : i32
    %c0_i32_0 = arith.constant 0 : i32
    %c0_i32_1 = arith.constant 0 : i32
    return %c0_i32, %c0_i32_0 : i32, i32
  }
  func.func @transform_9(%arg0: i32) -> (i32, i32) {
    %c0_i32 = arith.constant 0 : i32
    %c0_i32_0 = arith.constant 0 : i32
    return %arg0, %c0_i32 : i32, i32
  }
}

</mosaic_0001>

<bundles_post_ra>
// kernel: tpu_custom_call.1
= control target key start
LH: loop header
LB: loop body
LE: loop exit
PB: predicated region body
PF: predicated region fallthrough
CT: control target
= control target key end

     0   :  { %s493_s0 = inlined_call_operand.vmem [shape: bf16[8,3], index: 0, kind: input, shape index: {}]   ;;  %s494_s1 = inlined_call_operand.vmem [shape: bf16[8,2], index: 1, kind: input, shape index: {}]   ;;  %s495_s2 = inlined_call_operand.vmem [shape: bf16[3,128], index: 2, kind: input, shape index: {}]   ;;  %s496_s3 = inlined_call_operand.vmem [shape: bf16[2,128], index: 3, kind: input, shape index: {}]   ;;  %s497_s4 = inlined_call_operand.vmem [shape: f32[1,128], index: 4, kind: input, shape index: {}]   ;;  %s498_s5 = inlined_call_operand.hbm [shape: bf16[128,128], index: 5, kind: input, shape index: {}]   ;;  %s499_s6 = inlined_call_operand.vmem [shape: f32[1,128], index: 6, kind: input, shape index: {}]   ;;  %s500_s7 = inlined_call_operand.vmem [shape: f32[1,128], index: 7, kind: input, shape index: {}]   ;;  %s501_s8 = inlined_call_operand.<no memory space> [shape: f32[1,1], index: 8, kind: input, shape index: {}]   ;;  %s502_s9 = inlined_call_operand.vmem [shape: f32[8,1], index: 9, kind: output, shape index: {}]  }
   0x1   :  { %v14_v0 = vstv %s501_s8 }
   0x2   :  { %15 = vst [vmem:[#allocation2] sm:$0x1] %v14_v0 }
   0x3   :  { %16 = vsyncpa [#allocation4], 0  ;;  %s395_s11 = smov [#allocation3]   ;;  %s371_s15 = scalar_lea.hbm %s498_s5, 1024 }
   0x4   :  { %s32_s12 = sshll.u32 %s395_s11, 4  ;;  %p372_p0 = scmp.ne.s32.totalorder %s498_s5, %s371_s15  ;;  %s33_s12 = int_to_ptr.vmem [resolvable:$true] %s32_s12 }
   0x5   :  { %p375_p1 = scmp.lt.u32.totalorder %s371_s15, %s498_s5 }
   0x7   :  { %p377_p2 = pnand %p375_p1, %p372_p0 }
   0x9   :  { %380 = shalt.err (!%p377_p2)
}
   0xa   :  { %s381_s8 = scalar_lea.vmem %s33_s12, 1024  ;;  %p386_p4 = scmp.lt.s32.totalorder %s33_s12, %s33_s12 }
   0xb   :  { %p382_p3 = scmp.ne.s32.totalorder %s33_s12, %s381_s8  ;;  %p387_p5 = scmp.lt.s32.totalorder %s381_s8, %s381_s8 }
   0xd   :  { %p388_p6 = por %p387_p5, %p386_p4 }
   0xf   :  { %p389_p7 = pnand %p388_p6, %p382_p3 }
  0x11   :  { %392 = shalt.err (!%p389_p7)
}
  0x12   :  { %s396_s20 = smov 64   ;;  %s397_s21 = smov 4  }
  0x13   :  { %38 = dma.hbm_to_vmem [thread:$0]  %s498_s5, 1024, %s33_s12, [#allocation4], %s396_s20, %s396_s20, %s397_s21  }
  0x14   :  { %393 = dma.done.wait [#allocation4], 1024  }
  0x15   :  { %394 = vsyncadd [#allocation4], 4294966272  ;;  %v398_v1 = vmov 0.0   ;;  %vm57_vm0 = vcmask 1040384   ;;  %vm399_vm1 = vmmov 0   ;;  %vm105_vm2 = vcmask 1041408  }
  0x16   :  { %325 = vmatprep.subr.bf16.mxu1 %v398_v1  ;;  %337 = vmatprep.subr.bf16.mxu0 %v398_v1  ;;  %v400_v2 = vmov 65535   ;;  %v50_v5 = vld [vmem:[%s495_s2] sm:$0x3]  ;;  %vm53_vm3 = vcmask 15360   ;;  %v364_v11 = vld [vmem:[#allocation3 + $0x8] sm:$0xff]   ;;  %v365_v12 = vld [vmem:[#allocation3 + $0x10] sm:$0xff]  }
  0x17   :  { %327 = vmatprep.mubr.msk.bf16.mxu1 %vm399_vm1, %v398_v1  ;;  %353 = vmatprep.mubr.msk.bf16.mxu0 %vm399_vm1, %v398_v1  ;;  %v106_v3 = vsel %vm57_vm0, 4294967295, %v400_v2  ;;  %v52_v6 = vld [vmem:[%s496_s3] sm:$0x1]  ;;  %v363_v9 = vld [vmem:[#allocation3] sm:$0xff]   ;;  %vm101_vm4 = vcmask 23552   ;;  %v368_v16 = vld [vmem:[#allocation3 + $0x28] sm:$0xff]  }
  0x18   :  { %v107_v4 = vsel %vm105_vm2, %v106_v3, 0  ;;  %v59_v7 = vsel %vm57_vm0, %v52_v6, 0  ;;  %v51_v8 = vld [vmem:[%s494_s1] sm:$0xf]  ;;  %338 = vmatpush3.bf16.msra.mxu0 %v363_v9  ;;  %v369_v17 = vld [vmem:[#allocation3 + $0x30] sm:$0xff]   ;;  %vm291_vm5 = vcmask 7168  }
  0x19   :  { %326 = vmatpush3.bf16.msra.mxu1 %v59_v7  ;;  %v109_v10 = vand.u32 %v107_v4, %v50_v5  ;;  %339 = vmatprep.subr.bf16.mxu0 %v398_v1  ;;  %v49_v13 = vld [vmem:[%s493_s0] sm:$0xf] }
  0x1a   :  { %331 = vmatprep.subr.bf16.mxu1 %v398_v1  ;;  %v366_v14 = vld [vmem:[#allocation3 + $0x18] sm:$0xff]   ;;  %v367_v15 = vld [vmem:[#allocation3 + $0x20] sm:$0xff]  }
  0x1b   :  { %v370_v18 = vld [vmem:[#allocation3 + $0x38] sm:$0xff]  }
  0x1c   :  { %328 = vmatmul.mubr.msk.bf16.vlgmr.msra.gmra.mrb[0].mxu1 %vm53_vm3, %v51_v8  ;;  %340 = vmatpush3.bf16.msra.mxu0 %v364_v11  ;;  %v300_v24 = vld [vmem:[%s497_s4] ss:$0 sm:$0xff] }
  0x1d   :  { %332 = vmatpush3.bf16.msra.mxu1 %v109_v10  ;;  %333 = vmatprep.mubr.msk.bf16.mxu1 %vm399_vm1, %v398_v1  ;;  %v301_v32 = vld [vmem:[%s499_s6] ss:$0 sm:$0xff] }
  0x1e   :  { %341 = vmatprep.subr.bf16.mxu0 %v398_v1  ;;  %v310_v37 = vld [vmem:[%s500_s7] ss:$0 sm:$0xff] }
  0x1f   :  { %v311_v41 = vld [vmem:[#allocation2] ss:$0 sm:$0xff] }
  0x20   :  { %342 = vmatpush3.bf16.msra.mxu0 %v365_v12 }
  0x21   :  { %343 = vmatprep.subr.bf16.mxu0 %v398_v1 }
  0x24   :  { %334 = vmatmul.mubr.msk.bf16.vlgmr.msra.gmra.mrb[4].mxu1 %vm101_vm4, %v49_v13  ;;  %344 = vmatpush3.bf16.msra.mxu0 %v366_v14 }
  0x25   :  { %345 = vmatprep.subr.bf16.mxu0 %v398_v1 }
  0x28   :  { %346 = vmatpush3.bf16.msra.mxu0 %v367_v15 }
  0x29   :  { %347 = vmatprep.subr.bf16.mxu0 %v398_v1 }
  0x2c   :  { %348 = vmatpush3.bf16.msra.mxu0 %v368_v16 }
  0x2d   :  { %349 = vmatprep.subr.bf16.mxu0 %v398_v1 }
  0x30   :  { %350 = vmatpush3.bf16.msra.mxu0 %v369_v17 }
  0x31   :  { %351 = vmatprep.subr.bf16.mxu0 %v398_v1 }
  0x34   :  { %352 = vmatpush3.bf16.msra.mxu0 %v370_v18 }
  0xef   :  { %v95_v19 = vpop.f32.mrb[0].mxu1 }
  0xf0   :  { %v329_v20 = vpop.f32.mrb[1].mxu1 }
  0xf1   :  { %v98_v21 = vpop.f32.mrb[2].mxu1 }
  0xf2   :  { %v330_v22 = vpop.f32.mrb[3].mxu1 }
  0xf7   :  { %v145_v23 = vpop.f32.mrb[4].mxu1 }
  0xf8   :  { %v146_v25 = vadd.f32 %v145_v23, %v95_v19  ;;  %v335_v26 = vpop.f32.mrb[5].mxu1 }
  0xf9   :  { %v148_v27 = vpop.f32.mrb[6].mxu1 }
  0xfa   :  { %v158_v28 = vadd.f32 %v300_v24, %v146_v25  ;;  %v336_v29 = vpop.f32.mrb[7].mxu1 }
  0xfc   :  { %v159_v30 = vmax.f32 %v158_v28, 0.0 }
  0xfe   :  { %v160_v31 = vpack.c.bf16 %v159_v30, %v159_v30 }
 0x100   :  { %354 = vmatmul.mubr.bf16.vlgmr.msra.gmra.mrb[0].mxu0 %v160_v31 }
 0x1d3   :  { %v266_v33 = vpop.f32.mrb[0].mxu0 }
 0x1d4   :  { %v267_v34 = vadd.f32 %v301_v32, %v266_v33  ;;  %v355_v35 = vpop.f32.mrb[1].mxu0 }
 0x1d5   :  { %v269_v36 = vpop.f32.mrb[2].mxu0 }
 0x1d6   :  { %v272_v38 = vmax.f32 %v267_v34, 0.0  ;;  %v356_v39 = vpop.f32.mrb[3].mxu0 }
 0x1d8   :  { %v280_v40 = vmul.f32 %v310_v37, %v272_v38 }
 0x1da   :  { %281 = vadd.xlane.f32.xlu0 %v280_v40 }
 0x267   :  { %v282_v42 = vpop.xlane.xlu0 %281 }
 0x268   :  { %v290_v43 = vadd.f32 %v311_v41, %v282_v42 }
 0x26a   :  { %292 = vst.msk [vmem:[%s502_s9] sm:$0xff] %vm291_vm5, %v290_v43 }
 0x26b   :  { %297 = vsyncpa [#allocation4], 1 }

</bundles_post_ra>
